<compile_context>
chip_gen: v6e
topology: v6e:2x2x1
jax: 0.10.0
libtpu: 0.0.40
codegen_flags: <defaults>
</compile_context>

<pallas_src>
import functools

import jax
import jax.numpy as jnp
from jax.experimental import pallas as pl
from jax.experimental.pallas import tpu as pltpu


def _round_up(n, m):
    return ((n + m - 1) // m) * m


def _cdiv(a, b):
    return -(-a // b)


def _sublane(dtype):
    # f32 -> 8, bf16 -> 16, int8/fp8 -> 32 (sublane packing of sub-32-bit dtypes).
    return max(8, 32 // jnp.dtype(dtype).itemsize)


def _vmem_budget_bytes():
    """Generation-aware usable-VMEM estimate (~0.8x physical), safe fallback = v7x 64 MiB."""
    try:
        phys = int(getattr(pltpu.get_tpu_info(), "vmem_capacity_bytes", 0)) or (64 << 20)
    except Exception:
        phys = 64 << 20
    return int(0.8 * phys)


# ----------------------------------------------------------------------------- kernels


def _mlp_kernel_resident(x_ref, w1_ref, b1_ref, w2_ref, b2_ref, o_ref, *, apply_sigmoid):
    """All weights VMEM-resident; one grid axis over the batch."""
    x = x_ref[...]
    if w1_ref.dtype != x.dtype:           # opt-in bf16 MXU path when params are bf16
        x = x.astype(w1_ref.dtype)
    h = jnp.dot(x, w1_ref[...], preferred_element_type=jnp.float32)
    h = jnp.maximum(h + b1_ref[...].astype(jnp.float32), 0.0)   # bias + ReLU (VPU), f32
    # Dropout: inference-mode identity (matches model.eval()).
    if w2_ref.dtype != jnp.float32:
        h = h.astype(w2_ref.dtype)
    y = jnp.dot(h, w2_ref[...], preferred_element_type=jnp.float32)
    y = y + b2_ref[...].astype(jnp.float32)
    if apply_sigmoid:
        y = jax.nn.sigmoid(y)              # exp/recip on the EUP slot -> ~free
    o_ref[...] = y.astype(o_ref.dtype)


def _mlp_kernel_ktiled(x_ref, w1_ref, b1_ref, w2_ref, b2_ref, o_ref, acc_ref, *, apply_sigmoid):
    """Hidden dim tiled (reduction axis last in the grid) with an f32 VMEM accumulator.

    ReLU is elementwise over the hidden dim, so summing per-hidden-tile contributions
    relu(x @ W1[:, kT] + b1[kT]) @ W2[kT, :] over k is exact.
    """
    k = pl.program_id(1)

    @pl.when(k == 0)
    def _():
        acc_ref[...] = jnp.zeros_like(acc_ref)

    x = x_ref[...]
    if w1_ref.dtype != x.dtype:
        x = x.astype(w1_ref.dtype)
    h = jnp.dot(x, w1_ref[...], preferred_element_type=jnp.float32)
    h = jnp.maximum(h + b1_ref[...].astype(jnp.float32), 0.0)
    if w2_ref.dtype != jnp.float32:
        h = h.astype(w2_ref.dtype)
    acc_ref[...] += jnp.dot(h, w2_ref[...], preferred_element_type=jnp.float32)

    @pl.when(k == pl.num_programs(1) - 1)
    def _():
        y = acc_ref[...] + b2_ref[...].astype(jnp.float32)
        if apply_sigmoid:
            y = jax.nn.sigmoid(y)
        o_ref[...] = y.astype(o_ref.dtype)


# ----------------------------------------------------------------------------- wrapper


def prepare_mlp_params(w1, b1, w2, b2, param_dtype=None):
    """Zero-pad parameter lane dims (hidden/output) to multiples of 128 — ONCE, at init time.

    Padded columns/rows are zero, so they contribute exactly 0 to every dot product.
    Optionally downcasts parameters (e.g. jnp.bfloat16) for the native-MXU path
    (accuracy tradeoff; f32 accumulation is kept in the kernel either way).
    """
    Din, H = w1.shape
    O = w2.shape[1]
    Hp = _round_up(H, 128)
    Op = _round_up(O, 128)
    if param_dtype is not None:
        w1, b1, w2, b2 = (a.astype(param_dtype) for a in (w1, b1, w2, b2))
    w1_p = jnp.zeros((Din, Hp), w1.dtype).at[:, :H].set(w1)
    b1_p = jnp.zeros((1, Hp), b1.dtype).at[0, :H].set(b1)
    w2_p = jnp.zeros((Hp, Op), w2.dtype).at[:H, :O].set(w2)
    b2_p = jnp.zeros((1, Op), b2.dtype).at[0, :O].set(b2)
    return dict(w1=w1_p, b1=b1_p, w2=w2_p, b2=b2_p, output_dim=O)


def _choose_tiling(B, Din, Hp, Op, x_isz, w_isz, o_isz, budget, max_block_b, hidden_block, sub):
    """Pick (TB, TH, n_k): batch tile, hidden tile, #hidden tiles, from the VMEM budget."""
    # Batch-tile cap: sublane-aligned, <= rounded batch, and split into >=2 tiles when the
    # batch allows, so dimension_semantics=("parallel",...) can use both v7x TensorCores.
    b_cap = min(_round_up(max_block_b, sub), _round_up(B, sub))
    if B >= 2 * sub:
        b_cap = min(b_cap, _round_up(_cdiv(B, 2), sub))
    b_cap = max(b_cap, sub)

    n_lane_blocks = Hp // 128
    if hidden_block is not None:
        th = min(_round_up(hidden_block, 128), Hp)
        while Hp % th != 0:           # hidden tile must divide Hp exactly (reduction dim:
            th -= 128                 # a partial tile would read out-of-bounds garbage)
        th_list = [th]
    else:
        th_list = [Hp // d for d in range(1, n_lane_blocks + 1) if n_lane_blocks % d == 0]

    for idx, th in enumerate(th_list):
        n_k = Hp // th
        w_buf = 1 if n_k == 1 else 2                    # resident weights single-buffered
        w_bytes = (w_buf * (Din * th + th + th * Op) + Op) * w_isz

        def tile_bytes(tb, th=th):
            return (2 * tb * Din * x_isz                # double-buffered X tiles
                    + 2 * tb * Op * o_isz               # double-buffered output tiles
                    + tb * Op * 4                       # f32 accumulator / result
                    + 2 * tb * th * 4)                  # f32 hidden activations + temps

        fits = w_bytes + tile_bytes(sub) <= budget
        if fits or idx == len(th_list) - 1:
            tb = sub
            while tb < b_cap and w_bytes + tile_bytes(min(2 * tb, b_cap)) <= budget:
                tb = min(2 * tb, b_cap)
            return tb, th, n_k, w_bytes + tile_bytes(tb)

    raise AssertionError("unreachable")


def mlp_forward(x, params, *, last_layer=None, max_block_b=1024, hidden_block=None):
    """Fused MLP forward (Linear -> ReLU -> Dropout[eval] -> Linear [-> Sigmoid]) as one Pallas kernel.

    x      : (B, input_dim), unpadded — DMA'd straight from HBM (no padding copy of X).
    params : dict from prepare_mlp_params (feature-padded once at init time).

    The last batch tile may be partial; its out-of-range rows compute on undefined data,
    are masked on the output store, and never appear in the (B, O) result.
    """
    w1_p, b1_p, w2_p, b2_p = params["w1"], params["b1"], params["w2"], params["b2"]
    O = params["output_dim"]
    B, Din = x.shape
    assert w1_p.shape[0] == Din, "input_dim mismatch between x and prepared params"
    Hp = w1_p.shape[1]
    Op = w2_p.shape[1]

    x_isz = jnp.dtype(x.dtype).itemsize
    w_isz = jnp.dtype(w1_p.dtype).itemsize
    o_isz = x_isz
    sub = _sublane(x.dtype)

    budget = _vmem_budget_bytes()
    TB, TH, n_k, vmem_need = _choose_tiling(
        B, Din, Hp, Op, x_isz, w_isz, o_isz, budget, max_block_b, hidden_block, sub)
    nb = _cdiv(B, TB)
    apply_sigmoid = (last_layer == "sigmoid")

    # Advisory cost estimate for XLA's scheduler.
    w_total_bytes = (Din * Hp + Hp + Hp * Op + Op) * w_isz
    cost = pl.CostEstimate(
        flops=2 * B * (Din * Hp + Hp * Op),
        transcendentals=B * O if apply_sigmoid else 0,
        bytes_accessed=x_isz * B * Din + o_isz * B * Op
        + w_total_bytes * (1 if n_k == 1 else nb),
    )
    vmem_limit = int(min(max(2 * vmem_need, 16 << 20), budget))
    out_shape = jax.ShapeDtypeStruct((B, Op), x.dtype)

    def build_and_run(single_buffer_weights):
        w_pipe = {"pipeline_mode": pl.Buffered(1)} if single_buffer_weights else {}
        if n_k == 1:
            kernel = functools.partial(_mlp_kernel_resident, apply_sigmoid=apply_sigmoid)
            grid = (nb,)
            in_specs = [
                pl.BlockSpec((TB, Din), lambda i: (i, 0)),            # X: pipelined over batch
                pl.BlockSpec((Din, Hp), lambda i: (0, 0), **w_pipe),  # W1: VMEM-resident
                pl.BlockSpec((1, Hp), lambda i: (0, 0), **w_pipe),    # b1: resident
                pl.BlockSpec((Hp, Op), lambda i: (0, 0), **w_pipe),   # W2: resident
                pl.BlockSpec((1, Op), lambda i: (0, 0), **w_pipe),    # b2: resident
            ]
            out_specs = pl.BlockSpec((TB, Op), lambda i: (i, 0))      # lane-dense (Op % 128 == 0)
            scratch_shapes = []
            dims = ("parallel",)
        else:
            kernel = functools.partial(_mlp_kernel_ktiled, apply_sigmoid=apply_sigmoid)
            grid = (nb, n_k)                                          # reduction axis last
            in_specs = [
                pl.BlockSpec((TB, Din), lambda i, k: (i, 0)),         # X: constant over k
                pl.BlockSpec((Din, TH), lambda i, k: (0, k)),         # W1 hidden tile
                pl.BlockSpec((1, TH), lambda i, k: (0, k)),           # b1 hidden tile
                pl.BlockSpec((TH, Op), lambda i, k: (k, 0)),          # W2 hidden tile
                pl.BlockSpec((1, Op), lambda i, k: (0, 0)),           # b2
            ]
            out_specs = pl.BlockSpec((TB, Op), lambda i, k: (i, 0))
            scratch_shapes = [pltpu.VMEM((TB, Op), jnp.float32)]
            dims = ("parallel", "arbitrary")

        call = pl.pallas_call(
            kernel,
            out_shape=out_shape,
            grid_spec=pltpu.PrefetchScalarGridSpec(
                num_scalar_prefetch=0,
                grid=grid,
                in_specs=in_specs,
                out_specs=out_specs,
                scratch_shapes=scratch_shapes,
            ),
            compiler_params=pltpu.CompilerParams(
                dimension_semantics=dims,
                vmem_limit_bytes=vmem_limit,
            ),
            cost_estimate=cost,
        )
        return call(x, w1_p, b1_p, w2_p, b2_p)

    if n_k == 1:
        try:
            out_p = build_and_run(True)    # single-buffer resident weights (halves their VMEM)
        except Exception:
            out_p = build_and_run(False)   # Pallas build without pipeline_mode support
    else:
        out_p = build_and_run(False)       # hidden tiles change every step -> keep double-buffered

    return out_p[:, :O]                    # strip output-feature padding (rows already exact B)


# ----------------------------------------------------------------------------- self-test


def _reference(x, w1, b1, w2, b2, last_layer):
    h = jnp.maximum(x @ w1 + b1, 0.0)
    y = h @ w2 + b2
    return jax.nn.sigmoid(y) if last_layer == "sigmoid" else y


if __name__ == "__main__":
    key = jax.random.PRNGKey(0)
    k1, k2, kx1, kx2 = jax.random.split(key, 4)

    def make_params(k, din, h, o):
        kw1, kb1, kw2, kb2 = jax.random.split(k, 4)
        # PyTorch Linear stores (out, in); weights here are pre-transposed to (in, out).
        w1 = jax.random.normal(kw1, (din, h), jnp.float32) * 0.1
        b1 = jax.random.normal(kb1, (h,), jnp.float32) * 0.1
        w2 = jax.random.normal(kw2, (h, o), jnp.float32) * 0.1
        b2 = jax.random.normal(kb2, (o,), jnp.float32) * 0.1
        return w1, b1, w2, b2

    # Test 1: resident-weight path, sigmoid head, partial last batch tile (B=24 -> TB=16, 2 tiles).
    batch, input_dim, hidden_dim, output_dim = 24, 16, 32, 8
    w1, b1, w2, b2 = make_params(k1, input_dim, hidden_dim, output_dim)
    x = jax.random.normal(kx1, (batch, input_dim), jnp.float32)
    params = prepare_mlp_params(w1, b1, w2, b2)            # padded ONCE at init time
    out = jax.block_until_ready(mlp_forward(x, params, last_layer="sigmoid"))
    ref = _reference(x, w1, b1, w2, b2, "sigmoid")
    assert out.shape == (batch, output_dim)
    assert jnp.allclose(out, ref, atol=1e-4, rtol=1e-4), "resident path mismatch"

    # Test 2: hidden-dim (reduction) tiled fallback with f32 accumulator (v7x large-H path).
    batch, input_dim, hidden_dim, output_dim = 20, 24, 256, 10
    w1, b1, w2, b2 = make_params(k2, input_dim, hidden_dim, output_dim)
    x = jax.random.normal(kx2, (batch, input_dim), jnp.float32)
    params = prepare_mlp_params(w1, b1, w2, b2)
    out = jax.block_until_ready(
        mlp_forward(x, params, last_layer=None, max_block_b=8, hidden_block=128))
    ref = _reference(x, w1, b1, w2, b2, None)
    assert out.shape == (batch, output_dim)
    assert jnp.allclose(out, ref, atol=1e-4, rtol=1e-4), "k-tiled path mismatch"

    # Test 3: optional bf16-parameter path (native bf16 MXU; accuracy tradeoff).
    params_bf16 = prepare_mlp_params(w1, b1, w2, b2, param_dtype=jnp.bfloat16)
    out_bf16 = jax.block_until_ready(mlp_forward(x, params_bf16, last_layer=None))
    assert jnp.allclose(out_bf16, ref, atol=5e-2, rtol=5e-2), "bf16 path mismatch"

    print("KERNEL_OK")
</pallas_src>

<mosaic_0001>
module attributes {stable_mosaic.version = 11 : i64} {
  func.func @_mlp_kernel_resident(%arg0: i32, %arg1: memref<16x16xf32, #tpu.memory_space<vmem>>, %arg2: memref<16x128xf32, #tpu.memory_space<vmem>>, %arg3: memref<1x128xf32, #tpu.memory_space<vmem>>, %arg4: memref<128x128xf32, #tpu.memory_space<vmem>>, %arg5: memref<1x128xf32, #tpu.memory_space<vmem>>, %arg6: memref<16x128xf32, #tpu.memory_space<vmem>>) attributes {dimension_semantics = [#tpu.dimension_semantics<parallel>], iteration_bounds = array<i64: 2>, scalar_prefetch = 0 : i64, scratch_operands = 0 : i64, tpu.core_type = #tpu.core_type<tc>, window_params = [{transform_indices = @transform_0, window_bounds = array<i64: 16, 16>}, {pipeline_mode = #tpu.pipeline_mode<synchronous>, transform_indices = @transform_1, window_bounds = array<i64: 16, 128>}, {pipeline_mode = #tpu.pipeline_mode<synchronous>, transform_indices = @transform_2, window_bounds = array<i64: 1, 128>}, {pipeline_mode = #tpu.pipeline_mode<synchronous>, transform_indices = @transform_3, window_bounds = array<i64: 128, 128>}, {pipeline_mode = #tpu.pipeline_mode<synchronous>, transform_indices = @transform_4, window_bounds = array<i64: 1, 128>}, {transform_indices = @transform_5, window_bounds = array<i64: 16, 128>}]} {
    %c0 = arith.constant 0 : index
    %c0_0 = arith.constant 0 : index
    %0 = vector.load %arg1[%c0, %c0_0] : memref<16x16xf32, #tpu.memory_space<vmem>>, vector<16x16xf32>
    %c0_1 = arith.constant 0 : index
    %c0_2 = arith.constant 0 : index
    %1 = vector.load %arg2[%c0_1, %c0_2] : memref<16x128xf32, #tpu.memory_space<vmem>>, vector<16x128xf32>
    %cst = arith.constant dense<0.000000e+00> : vector<16x128xf32>
    %2 = tpu.matmul %0, %1, %cst {dimension_numbers = #tpu.dot_dimension_numbers<[1], [0], [0], [1], [0, 0, 1, 1], [], []>} : vector<16x16xf32>, vector<16x128xf32>, vector<16x128xf32> -> vector<16x128xf32>
    %c0_3 = arith.constant 0 : index
    %c0_4 = arith.constant 0 : index
    %3 = vector.load %arg3[%c0_3, %c0_4] : memref<1x128xf32, #tpu.memory_space<vmem>>, vector<1x128xf32>
    %4 = vector.broadcast %3 : vector<1x128xf32> to vector<16x128xf32>
    %5 = arith.addf %2, %4 : vector<16x128xf32>
    %cst_5 = arith.constant 0.000000e+00 : f32
    %6 = vector.broadcast %cst_5 : f32 to vector<16x128xf32>
    %7 = arith.maximumf %5, %6 : vector<16x128xf32>
    %c0_6 = arith.constant 0 : index
    %c0_7 = arith.constant 0 : index
    %8 = vector.load %arg4[%c0_6, %c0_7] : memref<128x128xf32, #tpu.memory_space<vmem>>, vector<128x128xf32>
    %cst_8 = arith.constant dense<0.000000e+00> : vector<16x128xf32>
    %9 = tpu.matmul %7, %8, %cst_8 {dimension_numbers = #tpu.dot_dimension_numbers<[1], [0], [0], [1], [0, 0, 1, 1], [], []>} : vector<16x128xf32>, vector<128x128xf32>, vector<16x128xf32> -> vector<16x128xf32>
    %c0_9 = arith.constant 0 : index
    %c0_10 = arith.constant 0 : index
    %10 = vector.load %arg5[%c0_9, %c0_10] : memref<1x128xf32, #tpu.memory_space<vmem>>, vector<1x128xf32>
    %11 = vector.broadcast %10 : vector<1x128xf32> to vector<16x128xf32>
    %12 = arith.addf %9, %11 : vector<16x128xf32>
    %13 = arith.negf %12 : vector<16x128xf32>
    %14 = math.exp %13 : vector<16x128xf32>
    %cst_11 = arith.constant 1.000000e+00 : f32
    %15 = vector.broadcast %cst_11 : f32 to vector<16x128xf32>
    %16 = arith.addf %15, %14 : vector<16x128xf32>
    %17 = arith.divf %15, %16 : vector<16x128xf32>
    %c0_12 = arith.constant 0 : index
    %c0_13 = arith.constant 0 : index
    %18 = vector.load %arg6[%c0_12, %c0_13] : memref<16x128xf32, #tpu.memory_space<vmem>>, vector<16x128xf32>
    tpu.vector_store %arg6[%c0_12, %c0_13], %17 {strides = array<i32>} : memref<16x128xf32, #tpu.memory_space<vmem>>, vector<16x128xf32>,
    return
  }
  func.func @transform_0(%arg0: i32) -> (i32, i32) {
    %c0_i32 = arith.constant 0 : i32
    %c0_i32_0 = arith.constant 0 : i32
    return %arg0, %c0_i32 : i32, i32
  }
  func.func @transform_1(%arg0: i32) -> (i32, i32) {
    %c0_i32 = arith.constant 0 : i32
    %c0_i32_0 = arith.constant 0 : i32
    %c0_i32_1 = arith.constant 0 : i32
    return %c0_i32, %c0_i32_0 : i32, i32
  }
  func.func @transform_2(%arg0: i32) -> (i32, i32) {
    %c0_i32 = arith.constant 0 : i32
    %c0_i32_0 = arith.constant 0 : i32
    %c0_i32_1 = arith.constant 0 : i32
    return %c0_i32, %c0_i32_0 : i32, i32
  }
  func.func @transform_3(%arg0: i32) -> (i32, i32) {
    %c0_i32 = arith.constant 0 : i32
    %c0_i32_0 = arith.constant 0 : i32
    %c0_i32_1 = arith.constant 0 : i32
    return %c0_i32, %c0_i32_0 : i32, i32
  }
  func.func @transform_4(%arg0: i32) -> (i32, i32) {
    %c0_i32 = arith.constant 0 : i32
    %c0_i32_0 = arith.constant 0 : i32
    %c0_i32_1 = arith.constant 0 : i32
    return %c0_i32, %c0_i32_0 : i32, i32
  }
  func.func @transform_5(%arg0: i32) -> (i32, i32) {
    %c0_i32 = arith.constant 0 : i32
    %c0_i32_0 = arith.constant 0 : i32
    return %arg0, %c0_i32 : i32, i32
  }
}

module attributes {stable_mosaic.version = 11 : i64} {
  func.func @_mlp_kernel_resident(%arg0: i32, %arg1: memref<16x16xf32, #tpu.memory_space<vmem>>, %arg2: memref<16x128xf32, #tpu.memory_space<vmem>>, %arg3: memref<1x128xf32, #tpu.memory_space<vmem>>, %arg4: memref<128x128xf32, #tpu.memory_space<vmem>>, %arg5: memref<1x128xf32, #tpu.memory_space<vmem>>, %arg6: memref<16x128xf32, #tpu.memory_space<vmem>>) attributes {dimension_semantics = [#tpu.dimension_semantics<parallel>], iteration_bounds = array<i64: 2>, scalar_prefetch = 0 : i64, scratch_operands = 0 : i64, tpu.core_type = #tpu.core_type<tc>, window_params = [{transform_indices = @transform_0, window_bounds = array<i64: 16, 16>}, {pipeline_mode = #tpu.pipeline_mode<synchronous>, transform_indices = @transform_1, window_bounds = array<i64: 16, 128>}, {pipeline_mode = #tpu.pipeline_mode<synchronous>, transform_indices = @transform_2, window_bounds = array<i64: 1, 128>}, {pipeline_mode = #tpu.pipeline_mode<synchronous>, transform_indices = @transform_3, window_bounds = array<i64: 128, 128>}, {pipeline_mode = #tpu.pipeline_mode<synchronous>, transform_indices = @transform_4, window_bounds = array<i64: 1, 128>}, {transform_indices = @transform_5, window_bounds = array<i64: 16, 128>}]} {
    %c0 = arith.constant 0 : index
    %c0_0 = arith.constant 0 : index
    %0 = vector.load %arg1[%c0, %c0_0] : memref<16x16xf32, #tpu.memory_space<vmem>>, vector<16x16xf32>
    %c0_1 = arith.constant 0 : index
    %c0_2 = arith.constant 0 : index
    %1 = vector.load %arg2[%c0_1, %c0_2] : memref<16x128xf32, #tpu.memory_space<vmem>>, vector<16x128xf32>
    %cst = arith.constant dense<0.000000e+00> : vector<16x128xf32>
    %2 = tpu.matmul %0, %1, %cst {dimension_numbers = #tpu.dot_dimension_numbers<[1], [0], [0], [1], [0, 0, 1, 1], [], []>} : vector<16x16xf32>, vector<16x128xf32>, vector<16x128xf32> -> vector<16x128xf32>
    %c0_3 = arith.constant 0 : index
    %c0_4 = arith.constant 0 : index
    %3 = vector.load %arg3[%c0_3, %c0_4] : memref<1x128xf32, #tpu.memory_space<vmem>>, vector<1x128xf32>
    %4 = vector.broadcast %3 : vector<1x128xf32> to vector<16x128xf32>
    %5 = arith.addf %2, %4 : vector<16x128xf32>
    %cst_5 = arith.constant 0.000000e+00 : f32
    %6 = vector.broadcast %cst_5 : f32 to vector<16x128xf32>
    %7 = arith.maximumf %5, %6 : vector<16x128xf32>
    %c0_6 = arith.constant 0 : index
    %c0_7 = arith.constant 0 : index
    %8 = vector.load %arg4[%c0_6, %c0_7] : memref<128x128xf32, #tpu.memory_space<vmem>>, vector<128x128xf32>
    %cst_8 = arith.constant dense<0.000000e+00> : vector<16x128xf32>
    %9 = tpu.matmul %7, %8, %cst_8 {dimension_numbers = #tpu.dot_dimension_numbers<[1], [0], [0], [1], [0, 0, 1, 1], [], []>} : vector<16x128xf32>, vector<128x128xf32>, vector<16x128xf32> -> vector<16x128xf32>
    %c0_9 = arith.constant 0 : index
    %c0_10 = arith.constant 0 : index
    %10 = vector.load %arg5[%c0_9, %c0_10] : memref<1x128xf32, #tpu.memory_space<vmem>>, vector<1x128xf32>
    %11 = vector.broadcast %10 : vector<1x128xf32> to vector<16x128xf32>
    %12 = arith.addf %9, %11 : vector<16x128xf32>
    %13 = arith.negf %12 : vector<16x128xf32>
    %14 = math.exp %13 : vector<16x128xf32>
    %cst_11 = arith.constant 1.000000e+00 : f32
    %15 = vector.broadcast %cst_11 : f32 to vector<16x128xf32>
    %16 = arith.addf %15, %14 : vector<16x128xf32>
    %17 = arith.divf %15, %16 : vector<16x128xf32>
    %c0_12 = arith.constant 0 : index
    %c0_13 = arith.constant 0 : index
    %18 = vector.load %arg6[%c0_12, %c0_13] : memref<16x128xf32, #tpu.memory_space<vmem>>, vector<16x128xf32>
    tpu.vector_store %arg6[%c0_12, %c0_13], %17 {strides = array<i32>} : memref<16x128xf32, #tpu.memory_space<vmem>>, vector<16x128xf32>,
    return
  }
  func.func @transform_0(%arg0: i32) -> (i32, i32) {
    %c0_i32 = arith.constant 0 : i32
    %c0_i32_0 = arith.constant 0 : i32
    return %arg0, %c0_i32 : i32, i32
  }
  func.func @transform_1(%arg0: i32) -> (i32, i32) {
    %c0_i32 = arith.constant 0 : i32
    %c0_i32_0 = arith.constant 0 : i32
    %c0_i32_1 = arith.constant 0 : i32
    return %c0_i32, %c0_i32_0 : i32, i32
  }
  func.func @transform_2(%arg0: i32) -> (i32, i32) {
    %c0_i32 = arith.constant 0 : i32
    %c0_i32_0 = arith.constant 0 : i32
    %c0_i32_1 = arith.constant 0 : i32
    return %c0_i32, %c0_i32_0 : i32, i32
  }
  func.func @transform_3(%arg0: i32) -> (i32, i32) {
    %c0_i32 = arith.constant 0 : i32
    %c0_i32_0 = arith.constant 0 : i32
    %c0_i32_1 = arith.constant 0 : i32
    return %c0_i32, %c0_i32_0 : i32, i32
  }
  func.func @transform_4(%arg0: i32) -> (i32, i32) {
    %c0_i32 = arith.constant 0 : i32
    %c0_i32_0 = arith.constant 0 : i32
    %c0_i32_1 = arith.constant 0 : i32
    return %c0_i32, %c0_i32_0 : i32, i32
  }
  func.func @transform_5(%arg0: i32) -> (i32, i32) {
    %c0_i32 = arith.constant 0 : i32
    %c0_i32_0 = arith.constant 0 : i32
    return %arg0, %c0_i32 : i32, i32
  }
}

</mosaic_0001>

<bundles_post_ra>
// kernel: tpu_custom_call.1
= control target key start
LH: loop header
LB: loop body
LE: loop exit
PB: predicated region body
PF: predicated region fallthrough
CT: control target
= control target key end

     0   :  { %10 = vsyncpa [#allocation3], 0  ;;  %s992_s0 = inlined_call_operand.vmem [shape: f32[24,16], index: 0, kind: input, shape index: {}]   ;;  %s993_s1 = inlined_call_operand.vmem [shape: f32[16,128], index: 1, kind: input, shape index: {}]   ;;  %s994_s2 = inlined_call_operand.vmem [shape: f32[1,128], index: 2, kind: input, shape index: {}]   ;;  %s995_s3 = inlined_call_operand.hbm [shape: f32[128,128], index: 3, kind: input, shape index: {}]   ;;  %s996_s4 = inlined_call_operand.vmem [shape: f32[1,128], index: 4, kind: input, shape index: {}]   ;;  %s997_s5 = inlined_call_operand.hbm [shape: f32[24,128], index: 5, kind: output, shape index: {}]  }
   0x1   :  { %11 = vsyncpa [#allocation4], 0 }
   0x2   :  { %13 = vsyncpa [#allocation4 + $0x1], 0  ;;  %s844_s18 = smov 0   ;;  %s846_s19 = smov 0  }
   0x3   :  { %s848_s20 = smov 0   ;;  %s850_s21 = smov 0  }
   0x4 LB: > { %s865_s22 = sadd.s32 4294967295, %s806_s21   ;;  %s566_s23 = sadd.s32 4294967294, %s806_s21   ;;  %s806_s21 = sphi %s850_s21, %s1005_s21   ;;  %s802_s20 = sphi %s848_s20, %s1004_s20   ;;  %s798_s19 = sphi %s846_s19, %s1003_s19   ;;  %s794_s18 = sphi %s844_s18, %s1002_s18  }
   0x5   : > { %s869_s24 = sadd.s32 1, %s806_s21   ;;  %s136_s25 = sadd.s32 1, %s802_s20 }
   0x6   : > { %s133_s26 = ssub.s32 %s806_s21, %s869_s24  ;;  %p146_p0 = scmp.ne.s32.totalorder %s802_s20, %s798_s19 }
   0x7   : > { %p134_p1 = scmp.eq.s32.totalorder %s133_s26, 0  ;;  %p147_p2 = scmp.eq.s32.totalorder %s865_s22, 1 }
   0x8   : > { %p152_p3 = scmp.ne.s32.totalorder %s798_s19, %s794_s18  ;;  %p153_p4 = scmp.eq.s32.totalorder %s566_s23, 1 }
   0x9   : > { %s880_s27 = scalar_select %p134_p1, %s802_s20, %s136_s25  }
   0xa   : > { %p882_p5 = por %p147_p2, %p146_p0  ;;  %p886_p6 = por %p153_p4, %p152_p3 }
   0xb   : > { %p567_p7 = scmp.ge.s32.totalorder %s806_s21, 1  ;;  %p160_p8 = scmp.lt.s32.totalorder %s806_s21, 3 }
   0xc   : > { %s999_s29 = scalar_select %p886_p6, 1, 0 }
   0xd   : > { %p668_p9 = scmp.eq.s32.totalorder %s865_s22, 0  ;;  %p893_p10 = pnand %p567_p7, %p160_p8 }
   0xe   : > { %s808_s6 = smov [#allocation2]  }
   0xf   : > { %s178_s7 = sshll.u32 %s808_s6, 4  ;;  %p660_p11 = pneg %p893_p10  ;;  %s179_s7 = int_to_ptr.vmem [resolvable:$true] %s178_s7 }
  0x10   : > { %s727_s8 = scalar_lea.vmem %s179_s7, 2048  ;;  %p735_p3 = scmp.lt.s32.totalorder %s179_s7, %s179_s7 }
  0x11   : > { %p661_p12 = pnand %p668_p9, %p660_p11  ;;  %p728_p0 = scmp.ne.s32.totalorder %s179_s7, %s727_s8 }
  0x12   : > { %p736_p4 = scmp.lt.s32.totalorder %s727_s8, %s727_s8 }
  0x13   : > { %p718_p13 = pneg %p661_p12 }
  0x14   : > { %p737_p6 = por %p736_p4, %p735_p3 }
  0x15   : > { %p730_p1 = pnand %p728_p0, %p718_p13 }
  0x17   : > { %p731_p2 = pneg %p730_p1 }
  0x19   : > { %p738_p7 = pnand %p737_p6, %p731_p2 }
  0x1b   : > { %741 = shalt.err (!%p738_p7)
}
  0x1c   : > { %s809_s9 = smov 128   ;;  %s810_s10 = smov 8  }
  0x1d   : > { %663 = dma.hbm_to_vmem [thread:$0]  (!%p661_p12), %s995_s3, 2048, %s179_s7, [#allocation3], %s809_s9, %s809_s9, %s810_s10  }
  0x1e   : > { %214 = sbr.rel (%p893_p10) target bundleno = 502 (0x1f6), region = 40 }
  0x23   : > { %785 = dma.done.wait (%p668_p9), [#allocation3], 2048  }
  0x24   : > { %787 = vsyncadd (%p668_p9), [#allocation3], 4294965248  ;;  %s911_s13 = sshll.u32 %s865_s22, 1  ;;  %vm276_vm0 = vcmask 130048   ;;  %v268_v0 = vld [vmem:[%s993_s1 + $0x8] sm:$0xff]  ;;  %v267_v1 = vld [vmem:[%s993_s1] sm:$0xff] }
  0x25   : > { %p251_p6 = scmp.lt.s32.totalorder %s911_s13, 2  ;;  %613 = vmatprep.subr.mxu0 %v268_v0  ;;  %v375_v3 = vld [vmem:[#allocation2 + $0x78] sm:$0xff]  ;;  %v374_v4 = vld [vmem:[#allocation2 + $0x70] sm:$0xff]  ;;  %v373_v6 = vld [vmem:[#allocation2 + $0x68] sm:$0xff]  ;;  %s243_s9 = sand.u32 1, %s798_s19  }
  0x26   : > { %614 = vmatpush3.msra.mxu0 %v268_v0  ;;  %620 = vmatprep.subr.mxu1 %v375_v3  ;;  %v372_v7 = vld [vmem:[#allocation2 + $0x60] sm:$0xff]  ;;  %v371_v8 = vld [vmem:[#allocation2 + $0x58] sm:$0xff]  ;;  %v370_v9 = vld [vmem:[#allocation2 + $0x50] sm:$0xff]  ;;  %s572_s12 = sshll.u32 %s243_s9, 4  ;;  %s481_s16 = ssub.s32 (%p882_p5), 3, %s911_s13 }
  0x27   : > { %s252_s14 = scalar_select %p251_p6, %s911_s13, 2  ;;  %615 = vmatprep.subr.mxu0 %v267_v1  ;;  %621 = vmatpush3.msra.mxu1 %v375_v3  ;;  %v369_v10 = vld [vmem:[#allocation2 + $0x48] sm:$0xff]  ;;  %v368_v11 = vld [vmem:[#allocation2 + $0x40] sm:$0xff]  ;;  %v367_v12 = vld [vmem:[#allocation2 + $0x38] sm:$0xff] }
  0x28   : > { %616 = vmatpush3.msra.mxu0 %v267_v1  ;;  %622 = vmatprep.subr.mxu1 %v374_v4  ;;  %v366_v13 = vld [vmem:[#allocation2 + $0x30] sm:$0xff]  ;;  %v365_v14 = vld [vmem:[#allocation2 + $0x28] sm:$0xff]  ;;  %v364_v15 = vld [vmem:[#allocation2 + $0x20] sm:$0xff]  ;;  %p482_p8 = scmp.lt.s32.totalorder (%p882_p5), %s481_s16, 2 }
  0x29   : > { %s574_s15 = sshll.u32 %s252_s14, 3  ;;  %623 = vmatpush3.msra.mxu1 %v374_v4  ;;  %v363_v16 = vld [vmem:[#allocation2 + $0x18] sm:$0xff]  ;;  %v362_v17 = vld [vmem:[#allocation2 + $0x10] sm:$0xff]  ;;  %v361_v18 = vld [vmem:[#allocation2 + $0x8] sm:$0xff]  ;;  %s245_s14 = scalar_lea.vmem [#allocation5], %s572_s12 }
  0x2a   : > { %s254_s23 = scalar_lea.vmem %s992_s0, %s574_s15  ;;  %624 = vmatprep.subr.mxu1 %v373_v6  ;;  %v360_v19 = vld [vmem:[#allocation2] sm:$0xff]  ;;  %s933_s15 = scalar_lea.sflag [#allocation4], %s243_s9 }
  0x2b   : > { %v265_v2 = vld [vmem:[%s254_s23] sm:$0xff]  ;;  %v266_v5 = vld [vmem:[%s254_s23 + $0x8] sm:$0xff]  ;;  %625 = vmatpush3.msra.mxu1 %v373_v6 }
  0x2c   : > { %617 = vmatprep.mubr.msk.f32.mxu0 %vm276_vm0, %v265_v2  ;;  %626 = vmatprep.subr.mxu1 %v372_v7  ;;  %v575_v20 = vld [vmem:[%s994_s2] ss:$0 sm:$0xff] }
  0x2d   : > { %618 = vmatmul.mubr.msk.f32.vlgmr.msra.gmra.mxu0 %vm276_vm0, %v266_v5  ;;  %627 = vmatpush3.msra.mxu1 %v372_v7  ;;  %v578_v27 = vld [vmem:[%s996_s4] ss:$0 sm:$0xff] }
  0x2e   : > { %628 = vmatprep.subr.mxu1 %v371_v8 }
  0x2f   : > { %629 = vmatpush3.msra.mxu1 %v371_v8 }
  0x30   : > { %630 = vmatprep.subr.mxu1 %v370_v9 }
  0x31   : > { %631 = vmatpush3.msra.mxu1 %v370_v9 }
  0x32   : > { %632 = vmatprep.subr.mxu1 %v369_v10 }
  0x33   : > { %633 = vmatpush3.msra.mxu1 %v369_v10 }
  0x34   : > { %634 = vmatprep.subr.mxu1 %v368_v11 }
  0x35   : > { %635 = vmatpush3.msra.mxu1 %v368_v11 }
  0x36   : > { %636 = vmatprep.subr.mxu1 %v367_v12 }
  0x37   : > { %637 = vmatpush3.msra.mxu1 %v367_v12 }
  0x38   : > { %638 = vmatprep.subr.mxu1 %v366_v13 }
  0x39   : > { %639 = vmatpush3.msra.mxu1 %v366_v13 }
  0x3a   : > { %640 = vmatprep.subr.mxu1 %v365_v14 }
  0x3b   : > { %641 = vmatpush3.msra.mxu1 %v365_v14 }
  0x3c   : > { %642 = vmatprep.subr.mxu1 %v364_v15 }
  0x3d   : > { %643 = vmatpush3.msra.mxu1 %v364_v15 }
  0x3e   : > { %644 = vmatprep.subr.mxu1 %v363_v16 }
  0x3f   : > { %645 = vmatpush3.msra.mxu1 %v363_v16 }
  0x40   : > { %646 = vmatprep.subr.mxu1 %v362_v17 }
  0x41   : > { %647 = vmatpush3.msra.mxu1 %v362_v17 }
  0x42   : > { %648 = vmatprep.subr.mxu1 %v361_v18 }
  0x43   : > { %649 = vmatpush3.msra.mxu1 %v361_v18 }
  0x44   : > { %650 = vmatprep.subr.mxu1 %v360_v19 }
  0x45   : > { %651 = vmatpush3.msra.mxu1 %v360_v19 }
  0xed   : > { %v619_v21 = vpop.f32.mrf.mxu0 }
  0xee   : > { %v355_v22 = vadd.f32 %v619_v21, %v575_v20 }
  0xef   : > { %v349_v23 = vpop.f32.mrf.mxu0 }
  0xf0   : > { %v350_v24 = vadd.f32 %v575_v20, %v349_v23  ;;  %v359_v26 = vmax.f32 %v355_v22, 0.0 }
  0xf2   : > { %v358_v25 = vmax.f32 %v350_v24, 0.0 }
  0xf4   : > { %652 = vmatprep.mubr.f32.mxu1 %v358_v25 }
  0xf5   : > { %653 = vmatmul.mubr.f32.vlgmr.msra.gmra.mxu1 %v359_v26 }
 0x1b5   : > { %v654_v28 = vpop.f32.mrf.mxu1 }
 0x1b6   : > { %v455_v29 = vadd.f32 %v654_v28, %v578_v27 }
 0x1b7   : > { %v449_v30 = vpop.f32.mrf.mxu1 }
 0x1b8   : > { %v580_v31 = vmul.f32 -1.442695, %v455_v29  ;;  %v450_v32 = vadd.f32 %v578_v27, %v449_v30 }
 0x1ba   : > { %708 = vpow2.f32 %v580_v31  ;;  %v579_v33 = vmul.f32 -1.442695, %v450_v32 }
 0x1bc   : > { %710 = vpow2.f32 %v579_v33 }
 0x1c7   : > { %v709_v34 = vpop.eup %708 }
 0x1c8   : > { %v465_v35 = vadd.f32 1.0, %v709_v34 }
 0x1c9   : > { %v711_v36 = vpop.eup %710 }
 0x1ca   : > { %712 = vrcp.f32 %v465_v35  ;;  %v464_v37 = vadd.f32 1.0, %v711_v36 }
 0x1cc   : > { %714 = vrcp.f32 %v464_v37 }
 0x1d6   : > { %479 = sbr.rel (!%p882_p5) target bundleno = 502 (0x1f6), region = 48 }
 0x1d7   : > { %v713_v38 = vpop.eup %712 }
 0x1d8   : > { %471 = vst [vmem:[%s245_s14 + $0x8] sm:$0xff] %v713_v38 }
 0x1d9   : > { %v715_v39 = vpop.eup %714 }
 0x1da   : > { %470 = vst [vmem:[%s245_s14] sm:$0xff] %v715_v39 }
 0x1db   : > { %s1007_s16 = smov (!%p482_p8, %s481_s16), 2 }
 0x1dc   : > { %s938_s17 = sshll.u32 %s1007_s16, 7 }
 0x1dd   : > { %s486_s23 = ssub.s32 256, %s938_s17 }
 0x1de   : > { %487 = vsyncadd %s933_s15, %s486_s23  ;;  %p584_p9 = scmp.ne.s32.totalorder %s938_s17, 0  ;;  %s590_s25 = sshll.u32 %s865_s22, 8 }
 0x1df   : > { %s947_s28 = scalar_lea.hbm %s997_s5, %s590_s25  ;;  %s492_s6 = sshll.u32 %s245_s14, 4  ;;  %s949_s6 = int_to_ptr.vmem [resolvable:$true] %s492_s6 }
 0x1e0   : > { %s742_s13 = scalar_lea.vmem %s949_s6, %s938_s17  ;;  %s811_s7 = smov [#allocation5]  }
 0x1e1   : > { %p743_p5 = scmp.ne.s32.totalorder %s949_s6, %s742_s13  ;;  %s746_s8 = sshll.u32 %s811_s7, 4  ;;  %s747_s8 = int_to_ptr.vmem [resolvable:$false] %s746_s8 }
 0x1e2   : > { %s748_s22 = scalar_lea.vmem %s747_s8, 512  ;;  %p749_p12 = scmp.lt.s32.totalorder %s949_s6, %s747_s8 }
 0x1e3   : > { %p744_p10 = pnand %p743_p5, %p584_p9  ;;  %p750_p13 = scmp.lt.s32.totalorder %s748_s22, %s742_s13 }
 0x1e5   : > { %p745_p11 = pneg %p744_p10  ;;  %p751_p0 = por %p750_p13, %p749_p12 }
 0x1e7   : > { %p752_p1 = pnand %p751_p0, %p745_p11 }
 0x1e9   : > { %755 = shalt.err (!%p752_p1)
}
 0x1ea   : > { %s756_s9 = scalar_lea.hbm %s947_s28, %s938_s17  ;;  %s760_s12 = scalar_lea.hbm %s997_s5, 384 }
 0x1eb   : > { %p757_p2 = scmp.ne.s32.totalorder %s947_s28, %s756_s9  ;;  %p761_p7 = scmp.lt.s32.totalorder %s947_s28, %s997_s5 }
 0x1ec   : > { %p762_p6 = scmp.lt.s32.totalorder %s760_s12, %s756_s9 }
 0x1ed   : > { %p758_p3 = pnand %p757_p2, %p584_p9 }
 0x1ee   : > { %p763_p8 = por %p762_p6, %p761_p7 }
 0x1ef   : > { %p759_p4 = pneg %p758_p3 }
 0x1f1   : > { %p764_p5 = pnand %p763_p8, %p759_p4 }
 0x1f3   : > { %767 = shalt.err (!%p764_p5)
}
 0x1f4   : > { %s812_s23 = smov 128   ;;  %s813_s25 = smov 8  }
 0x1f5   : > { %498 = dma.vmem_to_hbm [thread:$0]  (%p584_p9), %s949_s6, %s938_s17, %s947_s28, %s933_s15, %s812_s23, %s812_s23, %s813_s25  }
 0x1f6 PF: > { %p670_p10 = scmp.ge.s32.totalorder %s806_s21, 2  ;;  %s507_s26 = sand.u32 1, %s794_s18  }
 0x1f7   : > { %p1001_p11 = scmp.ne.s32.totalorder %s999_s29, 0  ;;  %s508_s30 = scalar_lea.sflag [#allocation4], %s507_s26 }
 0x1f9   : > { %p665_p12 = pnand %p670_p10, %p1001_p11 }
 0x1fb   : > { %p666_p13 = pneg %p665_p12 }
 0x1fd   : > { %789 = dma.done.wait (%p666_p13), %s508_s30, 256  }
 0x1fe   : > { %791 = vsyncadd (%p666_p13), %s508_s30, 4294967040  ;;  %p16_p0 = scmp.ge.s32.totalorder %s869_s24, 4   ;;  %s1002_s18 = smov %s798_s19 }
 0x1ff   : > { %s1003_s19 = smov %s802_s20  ;;  %s1004_s20 = smov %s880_s27 }
 0x200   : > { %s1005_s21 = smov %s869_s24  ;;  %18 = sbr.rel (!%p16_p0) target bundleno = 4 (0x4), region = 80 }
 0x205   :  { %513 = vsyncpa [#allocation3], 1 }
 0x206   :  { %515 = vsyncpa [#allocation3 + $0x1], 1 }
 0x207   :  { %516 = vsyncpa [#allocation4], 1 }
 0x208   :  { %518 = vsyncpa [#allocation4 + $0x1], 1 }

// kernel: tpu_custom_call.1
= control target key start
LH: loop header
LB: loop body
LE: loop exit
PB: predicated region body
PF: predicated region fallthrough
CT: control target
= control target key end

     0   :  { %10 = vsyncpa [#allocation3], 0  ;;  %s992_s0 = inlined_call_operand.vmem [shape: f32[24,16], index: 0, kind: input, shape index: {}]   ;;  %s993_s1 = inlined_call_operand.vmem [shape: f32[16,128], index: 1, kind: input, shape index: {}]   ;;  %s994_s2 = inlined_call_operand.vmem [shape: f32[1,128], index: 2, kind: input, shape index: {}]   ;;  %s995_s3 = inlined_call_operand.hbm [shape: f32[128,128], index: 3, kind: input, shape index: {}]   ;;  %s996_s4 = inlined_call_operand.vmem [shape: f32[1,128], index: 4, kind: input, shape index: {}]   ;;  %s997_s5 = inlined_call_operand.hbm [shape: f32[24,128], index: 5, kind: output, shape index: {}]  }
   0x1   :  { %11 = vsyncpa [#allocation4], 0 }
   0x2   :  { %13 = vsyncpa [#allocation4 + $0x1], 0  ;;  %s844_s18 = smov 0   ;;  %s846_s19 = smov 0  }
   0x3   :  { %s848_s20 = smov 0   ;;  %s850_s21 = smov 0  }
   0x4 LB: > { %s865_s22 = sadd.s32 4294967295, %s806_s21   ;;  %s566_s23 = sadd.s32 4294967294, %s806_s21   ;;  %s806_s21 = sphi %s850_s21, %s1005_s21   ;;  %s802_s20 = sphi %s848_s20, %s1004_s20   ;;  %s798_s19 = sphi %s846_s19, %s1003_s19   ;;  %s794_s18 = sphi %s844_s18, %s1002_s18  }
   0x5   : > { %s869_s24 = sadd.s32 1, %s806_s21   ;;  %s136_s25 = sadd.s32 1, %s802_s20 }
   0x6   : > { %s133_s26 = ssub.s32 %s806_s21, %s869_s24  ;;  %p146_p0 = scmp.ne.s32.totalorder %s802_s20, %s798_s19 }
   0x7   : > { %p134_p1 = scmp.eq.s32.totalorder %s133_s26, 0  ;;  %p147_p2 = scmp.eq.s32.totalorder %s865_s22, 1 }
   0x8   : > { %p152_p3 = scmp.ne.s32.totalorder %s798_s19, %s794_s18  ;;  %p153_p4 = scmp.eq.s32.totalorder %s566_s23, 1 }
   0x9   : > { %s880_s27 = scalar_select %p134_p1, %s802_s20, %s136_s25  }
   0xa   : > { %p882_p5 = por %p147_p2, %p146_p0  ;;  %p886_p6 = por %p153_p4, %p152_p3 }
   0xb   : > { %p567_p7 = scmp.ge.s32.totalorder %s806_s21, 1  ;;  %p160_p8 = scmp.lt.s32.totalorder %s806_s21, 3 }
   0xc   : > { %s999_s29 = scalar_select %p886_p6, 1, 0 }
   0xd   : > { %p668_p9 = scmp.eq.s32.totalorder %s865_s22, 0  ;;  %p893_p10 = pnand %p567_p7, %p160_p8 }
   0xe   : > { %s808_s6 = smov [#allocation2]  }
   0xf   : > { %s178_s7 = sshll.u32 %s808_s6, 4  ;;  %p660_p11 = pneg %p893_p10  ;;  %s179_s7 = int_to_ptr.vmem [resolvable:$true] %s178_s7 }
  0x10   : > { %s727_s8 = scalar_lea.vmem %s179_s7, 2048  ;;  %p735_p3 = scmp.lt.s32.totalorder %s179_s7, %s179_s7 }
  0x11   : > { %p661_p12 = pnand %p668_p9, %p660_p11  ;;  %p728_p0 = scmp.ne.s32.totalorder %s179_s7, %s727_s8 }
  0x12   : > { %p736_p4 = scmp.lt.s32.totalorder %s727_s8, %s727_s8 }
  0x13   : > { %p718_p13 = pneg %p661_p12 }
  0x14   : > { %p737_p6 = por %p736_p4, %p735_p3 }
  0x15   : > { %p730_p1 = pnand %p728_p0, %p718_p13 }
  0x17   : > { %p731_p2 = pneg %p730_p1 }
  0x19   : > { %p738_p7 = pnand %p737_p6, %p731_p2 }
  0x1b   : > { %741 = shalt.err (!%p738_p7)
}
  0x1c   : > { %s809_s9 = smov 128   ;;  %s810_s10 = smov 8  }
  0x1d   : > { %663 = dma.hbm_to_vmem [thread:$0]  (!%p661_p12), %s995_s3, 2048, %s179_s7, [#allocation3], %s809_s9, %s809_s9, %s810_s10  }
  0x1e   : > { %214 = sbr.rel (%p893_p10) target bundleno = 502 (0x1f6), region = 40 }
  0x23   : > { %785 = dma.done.wait (%p668_p9), [#allocation3], 2048  }
  0x24   : > { %787 = vsyncadd (%p668_p9), [#allocation3], 4294965248  ;;  %s911_s13 = sshll.u32 %s865_s22, 1  ;;  %vm276_vm0 = vcmask 130048   ;;  %v268_v0 = vld [vmem:[%s993_s1 + $0x8] sm:$0xff]  ;;  %v267_v1 = vld [vmem:[%s993_s1] sm:$0xff] }
  0x25   : > { %p251_p6 = scmp.lt.s32.totalorder %s911_s13, 2  ;;  %613 = vmatprep.subr.mxu0 %v268_v0  ;;  %v375_v3 = vld [vmem:[#allocation2 + $0x78] sm:$0xff]  ;;  %v374_v4 = vld [vmem:[#allocation2 + $0x70] sm:$0xff]  ;;  %v373_v6 = vld [vmem:[#allocation2 + $0x68] sm:$0xff]  ;;  %s243_s9 = sand.u32 1, %s798_s19  }
  0x26   : > { %614 = vmatpush3.msra.mxu0 %v268_v0  ;;  %620 = vmatprep.subr.mxu1 %v375_v3  ;;  %v372_v7 = vld [vmem:[#allocation2 + $0x60] sm:$0xff]  ;;  %v371_v8 = vld [vmem:[#allocation2 + $0x58] sm:$0xff]  ;;  %v370_v9 = vld [vmem:[#allocation2 + $0x50] sm:$0xff]  ;;  %s572_s12 = sshll.u32 %s243_s9, 4  ;;  %s481_s16 = ssub.s32 (%p882_p5), 3, %s911_s13 }
  0x27   : > { %s252_s14 = scalar_select %p251_p6, %s911_s13, 2  ;;  %615 = vmatprep.subr.mxu0 %v267_v1  ;;  %621 = vmatpush3.msra.mxu1 %v375_v3  ;;  %v369_v10 = vld [vmem:[#allocation2 + $0x48] sm:$0xff]  ;;  %v368_v11 = vld [vmem:[#allocation2 + $0x40] sm:$0xff]  ;;  %v367_v12 = vld [vmem:[#allocation2 + $0x38] sm:$0xff] }
  0x28   : > { %616 = vmatpush3.msra.mxu0 %v267_v1  ;;  %622 = vmatprep.subr.mxu1 %v374_v4  ;;  %v366_v13 = vld [vmem:[#allocation2 + $0x30] sm:$0xff]  ;;  %v365_v14 = vld [vmem:[#allocation2 + $0x28] sm:$0xff]  ;;  %v364_v15 = vld [vmem:[#allocation2 + $0x20] sm:$0xff]  ;;  %p482_p8 = scmp.lt.s32.totalorder (%p882_p5), %s481_s16, 2 }
  0x29   : > { %s574_s15 = sshll.u32 %s252_s14, 3  ;;  %623 = vmatpush3.msra.mxu1 %v374_v4  ;;  %v363_v16 = vld [vmem:[#allocation2 + $0x18] sm:$0xff]  ;;  %v362_v17 = vld [vmem:[#allocation2 + $0x10] sm:$0xff]  ;;  %v361_v18 = vld [vmem:[#allocation2 + $0x8] sm:$0xff]  ;;  %s245_s14 = scalar_lea.vmem [#allocation5], %s572_s12 }
  0x2a   : > { %s254_s23 = scalar_lea.vmem %s992_s0, %s574_s15  ;;  %624 = vmatprep.subr.mxu1 %v373_v6  ;;  %v360_v19 = vld [vmem:[#allocation2] sm:$0xff]  ;;  %s933_s15 = scalar_lea.sflag [#allocation4], %s243_s9 }
  0x2b   : > { %v265_v2 = vld [vmem:[%s254_s23] sm:$0xff]  ;;  %v266_v5 = vld [vmem:[%s254_s23 + $0x8] sm:$0xff]  ;;  %625 = vmatpush3.msra.mxu1 %v373_v6 }
  0x2c   : > { %617 = vmatprep.mubr.msk.f32.mxu0 %vm276_vm0, %v265_v2  ;;  %626 = vmatprep.subr.mxu1 %v372_v7  ;;  %v575_v20 = vld [vmem:[%s994_s2] ss:$0 sm:$0xff] }
  0x2d   : > { %618 = vmatmul.mubr.msk.f32.vlgmr.msra.gmra.mxu0 %vm276_vm0, %v266_v5  ;;  %627 = vmatpush3.msra.mxu1 %v372_v7  ;;  %v578_v27 = vld [vmem:[%s996_s4] ss:$0 sm:$0xff] }
  0x2e   : > { %628 = vmatprep.subr.mxu1 %v371_v8 }
  0x2f   : > { %629 = vmatpush3.msra.mxu1 %v371_v8 }
  0x30   : > { %630 = vmatprep.subr.mxu1 %v370_v9 }
  0x31   : > { %631 = vmatpush3.msra.mxu1 %v370_v9 }
  0x32   : > { %632 = vmatprep.subr.mxu1 %v369_v10 }
  0x33   : > { %633 = vmatpush3.msra.mxu1 %v369_v10 }
  0x34   : > { %634 = vmatprep.subr.mxu1 %v368_v11 }
  0x35   : > { %635 = vmatpush3.msra.mxu1 %v368_v11 }
  0x36   : > { %636 = vmatprep.subr.mxu1 %v367_v12 }
  0x37   : > { %637 = vmatpush3.msra.mxu1 %v367_v12 }
  0x38   : > { %638 = vmatprep.subr.mxu1 %v366_v13 }
  0x39   : > { %639 = vmatpush3.msra.mxu1 %v366_v13 }
  0x3a   : > { %640 = vmatprep.subr.mxu1 %v365_v14 }
  0x3b   : > { %641 = vmatpush3.msra.mxu1 %v365_v14 }
  0x3c   : > { %642 = vmatprep.subr.mxu1 %v364_v15 }
  0x3d   : > { %643 = vmatpush3.msra.mxu1 %v364_v15 }
  0x3e   : > { %644 = vmatprep.subr.mxu1 %v363_v16 }
  0x3f   : > { %645 = vmatpush3.msra.mxu1 %v363_v16 }
  0x40   : > { %646 = vmatprep.subr.mxu1 %v362_v17 }
  0x41   : > { %647 = vmatpush3.msra.mxu1 %v362_v17 }
  0x42   : > { %648 = vmatprep.subr.mxu1 %v361_v18 }
  0x43   : > { %649 = vmatpush3.msra.mxu1 %v361_v18 }
  0x44   : > { %650 = vmatprep.subr.mxu1 %v360_v19 }
  0x45   : > { %651 = vmatpush3.msra.mxu1 %v360_v19 }
  0xed   : > { %v619_v21 = vpop.f32.mrf.mxu0 }
  0xee   : > { %v355_v22 = vadd.f32 %v619_v21, %v575_v20 }
  0xef   : > { %v349_v23 = vpop.f32.mrf.mxu0 }
  0xf0   : > { %v350_v24 = vadd.f32 %v575_v20, %v349_v23  ;;  %v359_v26 = vmax.f32 %v355_v22, 0.0 }
  0xf2   : > { %v358_v25 = vmax.f32 %v350_v24, 0.0 }
  0xf4   : > { %652 = vmatprep.mubr.f32.mxu1 %v358_v25 }
  0xf5   : > { %653 = vmatmul.mubr.f32.vlgmr.msra.gmra.mxu1 %v359_v26 }
 0x1b5   : > { %v654_v28 = vpop.f32.mrf.mxu1 }
 0x1b6   : > { %v455_v29 = vadd.f32 %v654_v28, %v578_v27 }
 0x1b7   : > { %v449_v30 = vpop.f32.mrf.mxu1 }
 0x1b8   : > { %v580_v31 = vmul.f32 -1.442695, %v455_v29  ;;  %v450_v32 = vadd.f32 %v578_v27, %v449_v30 }
 0x1ba   : > { %708 = vpow2.f32 %v580_v31  ;;  %v579_v33 = vmul.f32 -1.442695, %v450_v32 }
 0x1bc   : > { %710 = vpow2.f32 %v579_v33 }
 0x1c7   : > { %v709_v34 = vpop.eup %708 }
 0x1c8   : > { %v465_v35 = vadd.f32 1.0, %v709_v34 }
 0x1c9   : > { %v711_v36 = vpop.eup %710 }
 0x1ca   : > { %712 = vrcp.f32 %v465_v35  ;;  %v464_v37 = vadd.f32 1.0, %v711_v36 }
 0x1cc   : > { %714 = vrcp.f32 %v464_v37 }
 0x1d6   : > { %479 = sbr.rel (!%p882_p5) target bundleno = 502 (0x1f6), region = 48 }
 0x1d7   : > { %v713_v38 = vpop.eup %712 }
 0x1d8   : > { %471 = vst [vmem:[%s245_s14 + $0x8] sm:$0xff] %v713_v38 }
 0x1d9   : > { %v715_v39 = vpop.eup %714 }
 0x1da   : > { %470 = vst [vmem:[%s245_s14] sm:$0xff] %v715_v39 }
 0x1db   : > { %s1007_s16 = smov (!%p482_p8, %s481_s16), 2 }
 0x1dc   : > { %s938_s17 = sshll.u32 %s1007_s16, 7 }
 0x1dd   : > { %s486_s23 = ssub.s32 256, %s938_s17 }
 0x1de   : > { %487 = vsyncadd %s933_s15, %s486_s23  ;;  %p584_p9 = scmp.ne.s32.totalorder %s938_s17, 0  ;;  %s590_s25 = sshll.u32 %s865_s22, 8 }
 0x1df   : > { %s947_s28 = scalar_lea.hbm %s997_s5, %s590_s25  ;;  %s492_s6 = sshll.u32 %s245_s14, 4  ;;  %s949_s6 = int_to_ptr.vmem [resolvable:$true] %s492_s6 }
 0x1e0   : > { %s742_s13 = scalar_lea.vmem %s949_s6, %s938_s17  ;;  %s811_s7 = smov [#allocation5]  }
 0x1e1   : > { %p743_p5 = scmp.ne.s32.totalorder %s949_s6, %s742_s13  ;;  %s746_s8 = sshll.u32 %s811_s7, 4  ;;  %s747_s8 = int_to_ptr.vmem [resolvable:$false] %s746_s8 }
 0x1e2   : > { %s748_s22 = scalar_lea.vmem %s747_s8, 512  ;;  %p749_p12 = scmp.lt.s32.totalorder %s949_s6, %s747_s8 }
 0x1e3   : > { %p744_p10 = pnand %p743_p5, %p584_p9  ;;  %p750_p13 = scmp.lt.s32.totalorder %s748_s22, %s742_s13 }
 0x1e5   : > { %p745_p11 = pneg %p744_p10  ;;  %p751_p0 = por %p750_p13, %p749_p12 }
 0x1e7   : > { %p752_p1 = pnand %p751_p0, %p745_p11 }
 0x1e9   : > { %755 = shalt.err (!%p752_p1)
}
 0x1ea   : > { %s756_s9 = scalar_lea.hbm %s947_s28, %s938_s17  ;;  %s760_s12 = scalar_lea.hbm %s997_s5, 384 }
 0x1eb   : > { %p757_p2 = scmp.ne.s32.totalorder %s947_s28, %s756_s9  ;;  %p761_p7 = scmp.lt.s32.totalorder %s947_s28, %s997_s5 }
 0x1ec   : > { %p762_p6 = scmp.lt.s32.totalorder %s760_s12, %s756_s9 }
 0x1ed   : > { %p758_p3 = pnand %p757_p2, %p584_p9 }
 0x1ee   : > { %p763_p8 = por %p762_p6, %p761_p7 }
 0x1ef   : > { %p759_p4 = pneg %p758_p3 }
 0x1f1   : > { %p764_p5 = pnand %p763_p8, %p759_p4 }
 0x1f3   : > { %767 = shalt.err (!%p764_p5)
}
 0x1f4   : > { %s812_s23 = smov 128   ;;  %s813_s25 = smov 8  }
 0x1f5   : > { %498 = dma.vmem_to_hbm [thread:$0]  (%p584_p9), %s949_s6, %s938_s17, %s947_s28, %s933_s15, %s812_s23, %s812_s23, %s813_s25  }
 0x1f6 PF: > { %p670_p10 = scmp.ge.s32.totalorder %s806_s21, 2  ;;  %s507_s26 = sand.u32 1, %s794_s18  }
 0x1f7   : > { %p1001_p11 = scmp.ne.s32.totalorder %s999_s29, 0  ;;  %s508_s30 = scalar_lea.sflag [#allocation4], %s507_s26 }
 0x1f9   : > { %p665_p12 = pnand %p670_p10, %p1001_p11 }
 0x1fb   : > { %p666_p13 = pneg %p665_p12 }
 0x1fd   : > { %789 = dma.done.wait (%p666_p13), %s508_s30, 256  }
 0x1fe   : > { %791 = vsyncadd (%p666_p13), %s508_s30, 4294967040  ;;  %p16_p0 = scmp.ge.s32.totalorder %s869_s24, 4   ;;  %s1002_s18 = smov %s798_s19 }
 0x1ff   : > { %s1003_s19 = smov %s802_s20  ;;  %s1004_s20 = smov %s880_s27 }
 0x200   : > { %s1005_s21 = smov %s869_s24  ;;  %18 = sbr.rel (!%p16_p0) target bundleno = 4 (0x4), region = 80 }
 0x205   :  { %513 = vsyncpa [#allocation3], 1 }
 0x206   :  { %515 = vsyncpa [#allocation3 + $0x1], 1 }
 0x207   :  { %516 = vsyncpa [#allocation4], 1 }
 0x208   :  { %518 = vsyncpa [#allocation4 + $0x1], 1 }

</bundles_post_ra>
